<compile_context>
chip_gen: v7x
topology: tpu7x:2x2x1
jax: 0.10.0
libtpu: 0.0.40
codegen_flags: <defaults>
</compile_context>

<pallas_src>
import jax
import jax.numpy as jnp
from jax.experimental import pallas as pl
from jax.experimental.pallas import tpu as pltpu


# ----------------------------------------------------------------------------- kernel


def _attn_kernel(g_ref, x_ref, w_ref, out_ref):
    # g_ref: (1, F_g, tile_s), x_ref: (1, F_l, tile_s): channels on sublanes,
    # spatial on lanes -> lane-dense loads and stores.
    g = g_ref[0]                                  # (F_g, tile_s), native dtype
    x = x_ref[0]                                  # (F_l, tile_s), native dtype
    w = w_ref[...]                                # (F_int, F_g + F_l + 3), f32 packed

    f_g = g.shape[0]
    f_l = x.shape[0]
    f_int = w.shape[0]
    tile_s = g.shape[-1]

    wg = w[:, :f_g]                               # (F_int, F_g)
    wx = w[:, f_g:f_g + f_l]                      # (F_int, F_l)
    bsum = w[:, f_g + f_l:f_g + f_l + 1]          # (F_int, 1)  == bg + bx (host-summed)
    wpsi = w[:, f_g + f_l + 1:f_g + f_l + 2]      # (F_int, 1)
    bpsi = w[0:1, f_g + f_l + 2:f_g + f_l + 3]    # (1, 1)

    # Fused W_g / W_x branch: single accumulator over F_g + F_l input channels.
    cin_total = f_g + f_l
    if cin_total <= 64:
        # Tiny contraction: unrolled VPU FMA chain (MXU would be <10% utilized and
        # compute is filler under the HBM DMA anyway).
        acc = jnp.broadcast_to(bsum, (f_int, tile_s))
        for c in range(f_g):
            acc = acc + wg[:, c:c + 1] * g[c:c + 1, :].astype(jnp.float32)
        for c in range(f_l):
            acc = acc + wx[:, c:c + 1] * x[c:c + 1, :].astype(jnp.float32)
    else:
        # Larger channel counts: use the MXU.
        acc = (jnp.dot(wg, g.astype(jnp.float32), preferred_element_type=jnp.float32)
               + jnp.dot(wx, x.astype(jnp.float32), preferred_element_type=jnp.float32)
               + bsum)

    p = jnp.maximum(acc, 0.0)                     # relu, (F_int, tile_s), f32

    # psi branch: conv to 1 channel == weighted sum over F_int sublanes, then sigmoid.
    s = jnp.sum(wpsi * p, axis=0, keepdims=True) + bpsi   # (1, tile_s)
    psi = jax.nn.sigmoid(s)

    # Gate x; broadcast psi over the channel sublanes.
    if x.dtype == jnp.float32:
        gated = x * psi
    else:
        # bf16 inputs (v6e/v7x have bf16 VALU): keep the gating multiply in the input
        # dtype to halve vreg/VMEM pressure.  TODO(synk): prefer f32 math here on v5e.
        gated = x * psi.astype(x.dtype)
    out_ref[...] = gated[None].astype(out_ref.dtype)


# --------------------------------------------------------------------------- tiling


def _tpu_vmem_capacity_bytes():
    try:
        info = pltpu.get_tpu_info()
        cap = getattr(info, "vmem_capacity_bytes", None)
        if cap:
            return int(cap)
    except Exception:
        pass
    return 128 * 1024 * 1024  # conservative fallback (v5e/v6e)


def _pad_sublane(c, itemsize):
    mult = max(8, 32 // max(int(itemsize), 1))    # 8 for f32, 16 for bf16, 32 for i8
    return ((c + mult - 1) // mult) * mult


def _choose_tile_s(S, N, F_g, F_l, F_int, in_itemsize, out_itemsize,
                   vmem_cap, max_tile_s=16384, min_grid_steps=4):
    """Pick a large, 128-aligned spatial tile: VMEM-capped, generation-aware,
    divisor-of-S preferred (unmasked stores), with enough grid steps for megacore."""
    if S <= 128:
        return S

    # ~30% of per-core VMEM for the pipelined g/x/out windows + intermediates
    # (leaves headroom for Mosaic internal scratch; matters on v7x's 64 MiB).
    buffer_budget = max(4 * 1024 * 1024, int(vmem_cap * 0.30))

    # Per-voxel VMEM bytes, with sublane padding (F_l=4 occupies 8 rows in f32).
    fg_p = _pad_sublane(F_g, in_itemsize)
    fl_p = _pad_sublane(F_l, in_itemsize)
    fl_po = _pad_sublane(F_l, out_itemsize)
    fint_p = _pad_sublane(F_int, 4)
    per_s = 2 * in_itemsize * (fg_p + fl_p)        # double-buffered g/x input windows
    per_s += 2 * out_itemsize * fl_po              # double-buffered out window
    per_s += 4 * (fg_p + fl_p + 2 * fint_p + 4)    # f32 in-kernel intermediates

    cap = max(128, (buffer_budget // per_s) // 128 * 128)
    cap = min(cap, max_tile_s)

    # Keep >= min_grid_steps grid steps so v7x's 2 TensorCores both get work, but do
    # not shrink tiles below 512 lanes (>=85% of HBM roofline measured at 512+).
    steps_needed = -(-min_grid_steps // max(N, 1))
    if steps_needed > 1:
        par_cap = (S // steps_needed) // 128 * 128
        if par_cap >= 128:
            cap = min(cap, max(512, par_cap))

    cap_eff = max(128, min(cap, (S // 128) * 128))

    # Prefer a tile that evenly divides S -> no ragged last block, unmasked vst.
    if S % 128 == 0:
        q = S // 128
        limit = cap_eff // 128
        best = 128
        for d in range(min(q, limit), 0, -1):
            if q % d == 0:
                best = d * 128
                break
        if best * 2 >= cap_eff:      # divisor is close enough to the cap -> take it
            return best

    return cap_eff                   # ragged last tile handled by masked write-back


# -------------------------------------------------------------------------- wrapper


def _pack_params(params):
    """Pack all conv/BN-folded weights & biases into one resident f32 array:
    columns = [ wg | wx | (bg+bx) | wpsi | bpsi ]   (shape (F_int, F_g+F_l+3))."""
    wg = params["wg"].astype(jnp.float32)          # (F_int, F_g)
    wx = params["wx"].astype(jnp.float32)          # (F_int, F_l)
    bsum = (params["bg"] + params["bx"]).astype(jnp.float32)          # (F_int, 1)
    wpsi = params["wpsi"].astype(jnp.float32)      # (F_int, 1)
    f_int = wg.shape[0]
    bpsi_col = jnp.broadcast_to(params["bpsi"].astype(jnp.float32), (f_int, 1))
    return jnp.concatenate([wg, wx, bsum, wpsi, bpsi_col], axis=1)


def attention_block_pallas(g, x, params, *, max_tile_s=16384, interpret=False):
    """g: (N, F_g, D, H, W), x: (N, F_l, D, H, W) — NCDHW, like PyTorch."""
    N, F_g, D, H, W = g.shape
    _, F_l, _, _, _ = x.shape
    F_int = params["wg"].shape[0]
    S = D * H * W

    # Flatten spatial only (contiguous collapse -> free reshape, no extra HBM traffic).
    g3 = g.reshape(N, F_g, S)
    x3 = x.reshape(N, F_l, S)
    packed = _pack_params(params)                  # (F_int, F_g + F_l + 3), f32

    vmem_cap = _tpu_vmem_capacity_bytes()
    # ~60% of per-core VMEM, capped at 48 MiB (v5e/v6e) -> ~38 MiB on v7x's 64 MiB.
    vmem_limit = min(int(0.6 * vmem_cap), 48 * 1024 * 1024)

    tile_s = _choose_tile_s(S, N, F_g, F_l, F_int,
                            g.dtype.itemsize, x.dtype.itemsize,
                            vmem_cap, max_tile_s=max_tile_s)
    grid = (N, pl.cdiv(S, tile_s))

    out3 = pl.pallas_call(
        _attn_kernel,
        out_shape=jax.ShapeDtypeStruct((N, F_l, S), x.dtype),
        grid_spec=pltpu.PrefetchScalarGridSpec(
            num_scalar_prefetch=0,
            grid=grid,
            in_specs=[
                pl.BlockSpec((1, F_g, tile_s), lambda n, s: (n, 0, s)),   # g tile
                pl.BlockSpec((1, F_l, tile_s), lambda n, s: (n, 0, s)),   # x tile
                # Single packed weight/bias array, constant index_map -> VMEM-resident.
                pl.BlockSpec(packed.shape, lambda n, s: (0, 0)),
            ],
            out_specs=pl.BlockSpec((1, F_l, tile_s), lambda n, s: (n, 0, s)),
        ),
        compiler_params=pltpu.CompilerParams(
            dimension_semantics=("parallel", "parallel"),
            vmem_limit_bytes=vmem_limit,
        ),
        interpret=interpret,
    )(g3, x3, packed)

    return out3.reshape(N, F_l, D, H, W)


# ------------------------------------------------------------------ params / reference


def _fold_bn(conv_w, conv_b, gamma, beta, mean, var, eps=1e-5):
    """Fold eval-mode BatchNorm into a 1x1x1 conv. conv_w: (Cout, Cin)."""
    scale = gamma / jnp.sqrt(var + eps)            # (Cout,)
    w_folded = conv_w * scale[:, None]
    b_folded = (conv_b - mean) * scale + beta
    return w_folded, b_folded


def make_params(key, F_g, F_l, F_int):
    ks = jax.random.split(key, 9)
    # Raw conv weights in PyTorch Conv3d layout (Cout, Cin), 1x1x1 spatial dims squeezed.
    wg_raw = jax.random.normal(ks[0], (F_int, F_g), jnp.float32) * 0.2
    bg_raw = jax.random.normal(ks[1], (F_int,), jnp.float32) * 0.1
    wx_raw = jax.random.normal(ks[2], (F_int, F_l), jnp.float32) * 0.2
    bx_raw = jax.random.normal(ks[3], (F_int,), jnp.float32) * 0.1
    wp_raw = jax.random.normal(ks[4], (1, F_int), jnp.float32) * 0.2
    bp_raw = jax.random.normal(ks[5], (1,), jnp.float32) * 0.1

    def bn(k, c):
        k1, k2, k3, k4 = jax.random.split(k, 4)
        gamma = 1.0 + 0.1 * jax.random.normal(k1, (c,), jnp.float32)
        beta = 0.1 * jax.random.normal(k2, (c,), jnp.float32)
        mean = 0.1 * jax.random.normal(k3, (c,), jnp.float32)
        var = jnp.abs(jax.random.normal(k4, (c,), jnp.float32)) + 0.5
        return gamma, beta, mean, var

    wg, bg = _fold_bn(wg_raw, bg_raw, *bn(ks[6], F_int))
    wx, bx = _fold_bn(wx_raw, bx_raw, *bn(ks[7], F_int))
    wpsi, bpsi = _fold_bn(wp_raw, bp_raw, *bn(ks[8], 1))

    return {
        "wg": wg, "bg": bg.reshape(F_int, 1),
        "wx": wx, "bx": bx.reshape(F_int, 1),
        "wpsi": wpsi.reshape(F_int, 1), "bpsi": bpsi.reshape(1, 1),
    }


def reference_forward(g, x, params):
    """Pure-JAX reference (same folded-BN eval semantics, same layout)."""
    N, F_g, D, H, W = g.shape
    F_l = x.shape[1]
    S = D * H * W
    g3 = g.reshape(N, F_g, S).astype(jnp.float32)
    x3 = x.reshape(N, F_l, S).astype(jnp.float32)
    g1 = jnp.einsum("oc,ncs->nos", params["wg"], g3) + params["bg"][None]
    x1 = jnp.einsum("oc,ncs->nos", params["wx"], x3) + params["bx"][None]
    p = jnp.maximum(g1 + x1, 0.0)
    s = jnp.sum(params["wpsi"][None] * p, axis=1, keepdims=True) + params["bpsi"][None]
    psi = jax.nn.sigmoid(s)
    out = (x3 * psi).astype(x.dtype)
    return out.reshape(N, F_l, D, H, W)


if __name__ == "__main__":
    key = jax.random.PRNGKey(0)
    k_g, k_x, k_p = jax.random.split(key, 3)

    # Small shapes: N=2, F_g=8, F_l=4, F_int=8, spatial D=8, H=16, W=16 -> S = 2048
    N, F_g, F_l, F_int = 2, 8, 4, 8
    D, H, W = 8, 16, 16

    g = jax.random.normal(k_g, (N, F_g, D, H, W), jnp.float32)
    x = jax.random.normal(k_x, (N, F_l, D, H, W), jnp.float32)
    params = make_params(k_p, F_g, F_l, F_int)

    out = attention_block_pallas(g, x, params)
    out = jax.block_until_ready(out)

    ref = reference_forward(g, x, params)
    assert out.shape == x.shape
    assert jnp.allclose(out, ref, atol=1e-5, rtol=1e-5), "mismatch vs reference"

    print("KERNEL_OK")
</pallas_src>

<mosaic_0001>
module attributes {stable_mosaic.version = 11 : i64} {
  func.func @_attn_kernel(%arg0: i32, %arg1: i32, %arg2: memref<1x8x1024xf32, #tpu.memory_space<vmem>>, %arg3: memref<1x4x1024xf32, #tpu.memory_space<vmem>>, %arg4: memref<8x15xf32, #tpu.memory_space<vmem>>, %arg5: memref<1x4x1024xf32, #tpu.memory_space<vmem>>) attributes {dimension_semantics = [#tpu.dimension_semantics<parallel>, #tpu.dimension_semantics<parallel>], iteration_bounds = array<i64: 2, 2>, scalar_prefetch = 0 : i64, scratch_operands = 0 : i64, tpu.core_type = #tpu.core_type<tc>, window_params = [{transform_indices = @transform_0, window_bounds = array<i64: 1, 8, 1024>}, {transform_indices = @transform_1, window_bounds = array<i64: 1, 4, 1024>}, {pipeline_mode = #tpu.pipeline_mode<synchronous>, transform_indices = @transform_2, window_bounds = array<i64: 8, 15>}, {transform_indices = @transform_3, window_bounds = array<i64: 1, 4, 1024>}]} {
    %c0 = arith.constant 0 : index
    %c0_0 = arith.constant 0 : index
    %c0_1 = arith.constant 0 : index
    %0 = vector.load %arg2[%c0, %c0_0, %c0_1] : memref<1x8x1024xf32, #tpu.memory_space<vmem>>, vector<1x8x1024xf32>
    %1 = vector.shape_cast %0 : vector<1x8x1024xf32> to vector<8x1024xf32>
    %c0_2 = arith.constant 0 : index
    %c0_3 = arith.constant 0 : index
    %c0_4 = arith.constant 0 : index
    %2 = vector.load %arg3[%c0_2, %c0_3, %c0_4] : memref<1x4x1024xf32, #tpu.memory_space<vmem>>, vector<1x4x1024xf32>
    %3 = vector.shape_cast %2 : vector<1x4x1024xf32> to vector<4x1024xf32>
    %c0_5 = arith.constant 0 : index
    %c0_6 = arith.constant 0 : index
    %4 = vector.load %arg4[%c0_5, %c0_6] : memref<8x15xf32, #tpu.memory_space<vmem>>, vector<8x15xf32>
    %5 = vector.extract_strided_slice %4 {offsets = [0, 0], sizes = [8, 8], strides = [1, 1]} : vector<8x15xf32> to vector<8x8xf32>
    %6 = vector.extract_strided_slice %4 {offsets = [0, 8], sizes = [8, 4], strides = [1, 1]} : vector<8x15xf32> to vector<8x4xf32>
    %7 = vector.extract_strided_slice %4 {offsets = [0, 12], sizes = [8, 1], strides = [1, 1]} : vector<8x15xf32> to vector<8x1xf32>
    %8 = vector.extract_strided_slice %4 {offsets = [0, 13], sizes = [8, 1], strides = [1, 1]} : vector<8x15xf32> to vector<8x1xf32>
    %9 = vector.extract_strided_slice %4 {offsets = [0, 14], sizes = [1, 1], strides = [1, 1]} : vector<8x15xf32> to vector<1x1xf32>
    %10 = vector.shape_cast %7 : vector<8x1xf32> to vector<8x1xf32>
    %11 = vector.broadcast %10 : vector<8x1xf32> to vector<8x1024xf32>
    %12 = vector.extract_strided_slice %5 {offsets = [0, 0], sizes = [8, 1], strides = [1, 1]} : vector<8x8xf32> to vector<8x1xf32>
    %13 = vector.extract_strided_slice %1 {offsets = [0, 0], sizes = [1, 1024], strides = [1, 1]} : vector<8x1024xf32> to vector<1x1024xf32>
    %14 = vector.broadcast %12 : vector<8x1xf32> to vector<8x1024xf32>
    %15 = vector.broadcast %13 : vector<1x1024xf32> to vector<8x1024xf32>
    %16 = arith.mulf %14, %15 : vector<8x1024xf32>
    %17 = arith.addf %11, %16 : vector<8x1024xf32>
    %18 = vector.extract_strided_slice %5 {offsets = [0, 1], sizes = [8, 1], strides = [1, 1]} : vector<8x8xf32> to vector<8x1xf32>
    %19 = vector.extract_strided_slice %1 {offsets = [1, 0], sizes = [1, 1024], strides = [1, 1]} : vector<8x1024xf32> to vector<1x1024xf32>
    %20 = vector.broadcast %18 : vector<8x1xf32> to vector<8x1024xf32>
    %21 = vector.broadcast %19 : vector<1x1024xf32> to vector<8x1024xf32>
    %22 = arith.mulf %20, %21 : vector<8x1024xf32>
    %23 = arith.addf %17, %22 : vector<8x1024xf32>
    %24 = vector.extract_strided_slice %5 {offsets = [0, 2], sizes = [8, 1], strides = [1, 1]} : vector<8x8xf32> to vector<8x1xf32>
    %25 = vector.extract_strided_slice %1 {offsets = [2, 0], sizes = [1, 1024], strides = [1, 1]} : vector<8x1024xf32> to vector<1x1024xf32>
    %26 = vector.broadcast %24 : vector<8x1xf32> to vector<8x1024xf32>
    %27 = vector.broadcast %25 : vector<1x1024xf32> to vector<8x1024xf32>
    %28 = arith.mulf %26, %27 : vector<8x1024xf32>
    %29 = arith.addf %23, %28 : vector<8x1024xf32>
    %30 = vector.extract_strided_slice %5 {offsets = [0, 3], sizes = [8, 1], strides = [1, 1]} : vector<8x8xf32> to vector<8x1xf32>
    %31 = vector.extract_strided_slice %1 {offsets = [3, 0], sizes = [1, 1024], strides = [1, 1]} : vector<8x1024xf32> to vector<1x1024xf32>
    %32 = vector.broadcast %30 : vector<8x1xf32> to vector<8x1024xf32>
    %33 = vector.broadcast %31 : vector<1x1024xf32> to vector<8x1024xf32>
    %34 = arith.mulf %32, %33 : vector<8x1024xf32>
    %35 = arith.addf %29, %34 : vector<8x1024xf32>
    %36 = vector.extract_strided_slice %5 {offsets = [0, 4], sizes = [8, 1], strides = [1, 1]} : vector<8x8xf32> to vector<8x1xf32>
    %37 = vector.extract_strided_slice %1 {offsets = [4, 0], sizes = [1, 1024], strides = [1, 1]} : vector<8x1024xf32> to vector<1x1024xf32>
    %38 = vector.broadcast %36 : vector<8x1xf32> to vector<8x1024xf32>
    %39 = vector.broadcast %37 : vector<1x1024xf32> to vector<8x1024xf32>
    %40 = arith.mulf %38, %39 : vector<8x1024xf32>
    %41 = arith.addf %35, %40 : vector<8x1024xf32>
    %42 = vector.extract_strided_slice %5 {offsets = [0, 5], sizes = [8, 1], strides = [1, 1]} : vector<8x8xf32> to vector<8x1xf32>
    %43 = vector.extract_strided_slice %1 {offsets = [5, 0], sizes = [1, 1024], strides = [1, 1]} : vector<8x1024xf32> to vector<1x1024xf32>
    %44 = vector.broadcast %42 : vector<8x1xf32> to vector<8x1024xf32>
    %45 = vector.broadcast %43 : vector<1x1024xf32> to vector<8x1024xf32>
    %46 = arith.mulf %44, %45 : vector<8x1024xf32>
    %47 = arith.addf %41, %46 : vector<8x1024xf32>
    %48 = vector.extract_strided_slice %5 {offsets = [0, 6], sizes = [8, 1], strides = [1, 1]} : vector<8x8xf32> to vector<8x1xf32>
    %49 = vector.extract_strided_slice %1 {offsets = [6, 0], sizes = [1, 1024], strides = [1, 1]} : vector<8x1024xf32> to vector<1x1024xf32>
    %50 = vector.broadcast %48 : vector<8x1xf32> to vector<8x1024xf32>
    %51 = vector.broadcast %49 : vector<1x1024xf32> to vector<8x1024xf32>
    %52 = arith.mulf %50, %51 : vector<8x1024xf32>
    %53 = arith.addf %47, %52 : vector<8x1024xf32>
    %54 = vector.extract_strided_slice %5 {offsets = [0, 7], sizes = [8, 1], strides = [1, 1]} : vector<8x8xf32> to vector<8x1xf32>
    %55 = vector.extract_strided_slice %1 {offsets = [7, 0], sizes = [1, 1024], strides = [1, 1]} : vector<8x1024xf32> to vector<1x1024xf32>
    %56 = vector.broadcast %54 : vector<8x1xf32> to vector<8x1024xf32>
    %57 = vector.broadcast %55 : vector<1x1024xf32> to vector<8x1024xf32>
    %58 = arith.mulf %56, %57 : vector<8x1024xf32>
    %59 = arith.addf %53, %58 : vector<8x1024xf32>
    %60 = vector.extract_strided_slice %6 {offsets = [0, 0], sizes = [8, 1], strides = [1, 1]} : vector<8x4xf32> to vector<8x1xf32>
    %61 = vector.extract_strided_slice %3 {offsets = [0, 0], sizes = [1, 1024], strides = [1, 1]} : vector<4x1024xf32> to vector<1x1024xf32>
    %62 = vector.broadcast %60 : vector<8x1xf32> to vector<8x1024xf32>
    %63 = vector.broadcast %61 : vector<1x1024xf32> to vector<8x1024xf32>
    %64 = arith.mulf %62, %63 : vector<8x1024xf32>
    %65 = arith.addf %59, %64 : vector<8x1024xf32>
    %66 = vector.extract_strided_slice %6 {offsets = [0, 1], sizes = [8, 1], strides = [1, 1]} : vector<8x4xf32> to vector<8x1xf32>
    %67 = vector.extract_strided_slice %3 {offsets = [1, 0], sizes = [1, 1024], strides = [1, 1]} : vector<4x1024xf32> to vector<1x1024xf32>
    %68 = vector.broadcast %66 : vector<8x1xf32> to vector<8x1024xf32>
    %69 = vector.broadcast %67 : vector<1x1024xf32> to vector<8x1024xf32>
    %70 = arith.mulf %68, %69 : vector<8x1024xf32>
    %71 = arith.addf %65, %70 : vector<8x1024xf32>
    %72 = vector.extract_strided_slice %6 {offsets = [0, 2], sizes = [8, 1], strides = [1, 1]} : vector<8x4xf32> to vector<8x1xf32>
    %73 = vector.extract_strided_slice %3 {offsets = [2, 0], sizes = [1, 1024], strides = [1, 1]} : vector<4x1024xf32> to vector<1x1024xf32>
    %74 = vector.broadcast %72 : vector<8x1xf32> to vector<8x1024xf32>
    %75 = vector.broadcast %73 : vector<1x1024xf32> to vector<8x1024xf32>
    %76 = arith.mulf %74, %75 : vector<8x1024xf32>
    %77 = arith.addf %71, %76 : vector<8x1024xf32>
    %78 = vector.extract_strided_slice %6 {offsets = [0, 3], sizes = [8, 1], strides = [1, 1]} : vector<8x4xf32> to vector<8x1xf32>
    %79 = vector.extract_strided_slice %3 {offsets = [3, 0], sizes = [1, 1024], strides = [1, 1]} : vector<4x1024xf32> to vector<1x1024xf32>
    %80 = vector.broadcast %78 : vector<8x1xf32> to vector<8x1024xf32>
    %81 = vector.broadcast %79 : vector<1x1024xf32> to vector<8x1024xf32>
    %82 = arith.mulf %80, %81 : vector<8x1024xf32>
    %83 = arith.addf %77, %82 : vector<8x1024xf32>
    %cst = arith.constant 0.000000e+00 : f32
    %84 = vector.broadcast %cst : f32 to vector<8x1024xf32>
    %85 = arith.maximumf %83, %84 : vector<8x1024xf32>
    %86 = vector.broadcast %8 : vector<8x1xf32> to vector<8x1024xf32>
    %87 = arith.mulf %86, %85 : vector<8x1024xf32>
    %cst_7 = arith.constant dense<0.000000e+00> : vector<1024xf32>
    %88 = vector.multi_reduction <add>, %87, %cst_7 [0] : vector<8x1024xf32> to vector<1024xf32>
    %89 = vector.shape_cast %88 : vector<1024xf32> to vector<1x1024xf32>
    %90 = vector.broadcast %9 : vector<1x1xf32> to vector<1x1024xf32>
    %91 = arith.addf %89, %90 : vector<1x1024xf32>
    %92 = arith.negf %91 : vector<1x1024xf32>
    %93 = math.exp %92 : vector<1x1024xf32>
    %cst_8 = arith.constant 1.000000e+00 : f32
    %94 = vector.broadcast %cst_8 : f32 to vector<1x1024xf32>
    %95 = arith.addf %94, %93 : vector<1x1024xf32>
    %96 = arith.divf %94, %95 : vector<1x1024xf32>
    %97 = vector.broadcast %96 : vector<1x1024xf32> to vector<4x1024xf32>
    %98 = arith.mulf %3, %97 : vector<4x1024xf32>
    %99 = vector.shape_cast %98 : vector<4x1024xf32> to vector<1x4x1024xf32>
    %c0_9 = arith.constant 0 : index
    %c0_10 = arith.constant 0 : index
    %c0_11 = arith.constant 0 : index
    %100 = vector.load %arg5[%c0_9, %c0_10, %c0_11] : memref<1x4x1024xf32, #tpu.memory_space<vmem>>, vector<1x4x1024xf32>
    tpu.vector_store %arg5[%c0_9, %c0_10, %c0_11], %99 {strides = array<i32>} : memref<1x4x1024xf32, #tpu.memory_space<vmem>>, vector<1x4x1024xf32>,
    return
  }
  func.func @transform_0(%arg0: i32, %arg1: i32) -> (i32, i32, i32) {
    %c0_i32 = arith.constant 0 : i32
    %c0_i32_0 = arith.constant 0 : i32
    return %arg0, %c0_i32, %arg1 : i32, i32, i32
  }
  func.func @transform_1(%arg0: i32, %arg1: i32) -> (i32, i32, i32) {
    %c0_i32 = arith.constant 0 : i32
    %c0_i32_0 = arith.constant 0 : i32
    return %arg0, %c0_i32, %arg1 : i32, i32, i32
  }
  func.func @transform_2(%arg0: i32, %arg1: i32) -> (i32, i32) {
    %c0_i32 = arith.constant 0 : i32
    %c0_i32_0 = arith.constant 0 : i32
    %c0_i32_1 = arith.constant 0 : i32
    return %c0_i32, %c0_i32_0 : i32, i32
  }
  func.func @transform_3(%arg0: i32, %arg1: i32) -> (i32, i32, i32) {
    %c0_i32 = arith.constant 0 : i32
    %c0_i32_0 = arith.constant 0 : i32
    return %arg0, %c0_i32, %arg1 : i32, i32, i32
  }
}

</mosaic_0001>

<bundles_post_ra>
// kernel: tpu_custom_call.1
= control target key start
LH: loop header
LB: loop body
LE: loop exit
PB: predicated region body
PF: predicated region fallthrough
CT: control target
= control target key end

     0   :  { %s2694_s0 = inlined_call_operand.hbm [shape: f32[2,8,2048], index: 0, kind: input, shape index: {}]   ;;  %s2695_s1 = inlined_call_operand.hbm [shape: f32[2,4,2048], index: 1, kind: input, shape index: {}]   ;;  %s2696_s2 = inlined_call_operand.hbm [shape: f32[8,15], index: 2, kind: input, shape index: {}]   ;;  %s2697_s3 = inlined_call_operand.hbm [shape: f32[2,4,2048], index: 3, kind: output, shape index: {}]  }
   0x1   :  { %2714 = sst [smem:[#allocation49_spill]] %s2696_s2 }
   0x2   :  { %8 = vsyncpa [#allocation3], 0 }
   0x3   :  { %10 = vsyncpa [#allocation3 + $0x1], 0 }
   0x4   :  { %11 = vsyncpa [#allocation6], 0 }
   0x5   :  { %13 = vsyncpa [#allocation6 + $0x1], 0 }
   0x6   :  { %14 = vsyncpa [#allocation4], 0 }
   0x7   :  { %16 = vsyncpa [#allocation4 + $0x1], 0  ;;  %s1814_s12 = smov 0   ;;  %s1816_s13 = smov 0  }
   0x8   :  { %s1818_s14 = smov 0   ;;  %s1820_s15 = smov 0  }
   0x9   :  { %s1822_s16 = smov 0   ;;  %s1824_s17 = smov 0  }
   0xa   :  { %s1826_s18 = smov 0   ;;  %s1828_s19 = smov 0  }
   0xb LB: > { %2715 = sst [smem:[#allocation13_spill]] %s1745_s12  ;;  %s1855_s20 = sadd.s32 4294967295, %s1773_s19   ;;  %s1773_s19 = sphi %s1828_s19, %s22_s19   ;;  %s1769_s18 = sphi %s1826_s18, %s2871_s18   ;;  %s1765_s17 = sphi %s1824_s17, %s2866_s17   ;;  %s1761_s16 = sphi %s1822_s16, %s2870_s16   ;;  %s1757_s15 = sphi %s1820_s15, %s2865_s15   ;;  %s1753_s14 = sphi %s1818_s14, %s2869_s14   ;;  %s1749_s13 = sphi %s1816_s13, %s2868_s13   ;;  %s1745_s12 = sphi %s1814_s12, %s2867_s12  }
   0xc   : > { %2716 = sst [smem:[#allocation14_spill]] %s1765_s17  ;;  %s1392_s21 = sadd.s32 4294967294, %s1773_s19  }
   0xd   : > { %p2699_p0 = scmp.ne.s32.totalorder %s1753_s14, %s1749_s13  ;;  %p56_p1 = scmp.ne.s32.totalorder %s1749_s13, %s1745_s12 }
   0xe   : > { %p2698_p2 = scmp.eq.s32.totalorder %s1855_s20, 0  ;;  %p131_p3 = scmp.eq.s32.totalorder %s1855_s20, 3 }
   0xf   : > { %p137_p4 = scmp.eq.s32.totalorder %s1392_s21, 3  ;;  %p1393_p6 = scmp.ge.s32.totalorder %s1773_s19, 1 }
  0x10   : > { %p1867_p5 = por %p2698_p2, %p56_p1  ;;  %p1875_p7 = por %p131_p3, %p2699_p0 }
  0x11   : > { %p1879_p8 = por %p137_p4, %p56_p1  ;;  %p144_p9 = scmp.lt.s32.totalorder %s1773_s19, 5 }
  0x12   : > { %s2717_s23 = scalar_select %p1867_p5, 1, 0 }
  0x13   : > { %s2718_s24 = scalar_select %p1875_p7, 1, 0 }
  0x14   : > { %s2719_s25 = scalar_select %p1879_p8, 1, 0 }
  0x15   : > { %p1884_p10 = pnand %p1393_p6, %p144_p9  ;;  %s1775_s27 = smov [#allocation7]  }
  0x16   : > { %2720 = sst [smem:[#allocation15_spill]] %s2719_s25  ;;  %s157_s28 = sshll.u32 %s1775_s27, 4  ;;  %s158_s28 = int_to_ptr.vmem [resolvable:$true] %s157_s28 }
  0x17   : > { %s2721_s26 = scalar_select %p1884_p10, 1, 0 }
  0x18   : > { %p1433_p11 = pneg %p1884_p10  ;;  %s31_s30 = sadd.s32 1, %s1765_s17 }
  0x19   : > { %p1897_p13 = scmp.ge.s32.totalorder %s31_s30, 2  ;;  %s34_s5 = sadd.s32 1, %s1769_s18 }
  0x1a   : > { %p1892_p12 = pnand %p1433_p11, %p2698_p2  ;;  %s2724_s2 = sld [smem:[#allocation49_spill]] }
  0x1b   : > { %s2723_s4 = scalar_select %p1897_p13, 1, 0 }
  0x1c   : > { %p1581_p4 = pneg %p1892_p12 }
  0x20   : > { %s1579_s8 = scalar_lea.hbm %s2724_s2, 128 }
  0x21   : > { %p1580_p3 = scmp.ne.s32.totalorder %s2724_s2, %s1579_s8  ;;  %p1586_p11 = scmp.lt.u32.totalorder %s1579_s8, %s2724_s2 }
  0x23   : > { %p1582_p6 = pnand %p1581_p4, %p1580_p3 }
  0x25   : > { %p1583_p9 = pneg %p1582_p6 }
  0x27   : > { %p1588_p2 = pnand %p1586_p11, %p1583_p9 }
  0x29   : > { %1591 = shalt.err (!%p1588_p2)
}
  0x2a   : > { %s1592_s27 = scalar_lea.vmem %s158_s28, 128  ;;  %p1600_p7 = scmp.lt.s32.totalorder %s158_s28, %s158_s28 }
  0x2b   : > { %p1593_p1 = scmp.ne.s32.totalorder %s158_s28, %s1592_s27  ;;  %p1601_p5 = scmp.lt.s32.totalorder %s1592_s27, %s1592_s27 }
  0x2d   : > { %p1595_p0 = pnand %p1593_p1, %p1581_p4  ;;  %p1602_p10 = por %p1601_p5, %p1600_p7 }
  0x2f   : > { %p1596_p8 = pneg %p1595_p0 }
  0x31   : > { %p1603_p13 = pnand %p1602_p10, %p1596_p8 }
  0x33   : > { %1606 = shalt.err (!%p1603_p13)
}
  0x34   : > { %1436 = dma.hbm_to_vmem [thread:$0]  (!%p1892_p12), %s2724_s2, 128, %s158_s28, [#allocation6]  }
  0x35   : > { %p2725_p0 = scmp.ne.s32.totalorder %s2723_s4, 0  ;;  %p2727_p2 = scmp.ne.s32.totalorder %s1753_s14, %s1749_s13 }
  0x36   : > { %p2728_p5 = scmp.eq.s32.totalorder %s1773_s19, 0  ;;  %p1449_p10 = scmp.lt.s32.totalorder %s1773_s19, 4 }
  0x37   : > { %s2873_s30 = smov (%p2725_p0, %s31_s30), 0  ;;  %s2875_s5 = smov (!%p2725_p0, %s34_s5), %s1769_s18 }
  0x38   : > { %2726 = sst [smem:[#allocation16_spill]] %s2873_s30  ;;  %s39_s29 = ssub.s32 %s1765_s17, %s2873_s30 }
  0x39   : > { %p1933_p7 = por %p2728_p5, %p2727_p2  ;;  %p36_p8 = scmp.ge.s32.totalorder %s2875_s5, 2 }
  0x3a   : > { %s1939_s28 = sand.u32 1, %s1753_s14   ;;  %s1397_s9 = sshll.u32 %s1765_s17, 3 }
  0x3b   : > { %s2877_s5 = smov (%p36_p8, %s2875_s5), 0  ;;  %s1396_s4 = sshll.u32 %s1939_s28, 6 }
  0x3c   : > { %s38_s10 = ssub.s32 %s1769_s18, %s2877_s5  ;;  %s1398_s21 = sshll.u32 %s1769_s18, 4 }
  0x3d   : > { %s40_s11 = sor.u32 %s39_s29, %s38_s10  ;;  %s1948_s27 = sadd.s32 %s1398_s21, %s1397_s9 }
  0x3e   : > { %p41_p12 = scmp.eq.s32.totalorder %s40_s11, 0  ;;  %s1399_s6 = sshll.u32 %s1948_s27, 7 }
  0x3f   : > { %s172_s7 = scalar_lea.vmem [#allocation2], %s1396_s4  ;;  %s2730_s2 = sadd.s32 1, %s1753_s14 }
  0x40   : > { %s182_s22 = sshll.u32 %s172_s7, 4  ;;  %s1959_s12 = scalar_lea.hbm %s2694_s0, %s1399_s6  ;;  %s1961_s22 = int_to_ptr.vmem [resolvable:$true] %s182_s22 }
  0x41   : > { %s1954_s30 = scalar_select %p41_p12, %s1753_s14, %s2730_s2  }
  0x42   : > { %p1967_p13 = pnand %p1449_p10, %p1933_p7  ;;  %s1403_s2 = sshll.u32 %s1948_s27, 6 }
  0x43   : > { %s189_s9 = sand.u32 1, %s1773_s19   ;;  %s1400_s4 = sshll.u32 %s1939_s28, 5 }
  0x44   : > { %s169_s17 = scalar_lea.sflag [#allocation3], %s1939_s28  ;;  %s1607_s25 = scalar_lea.hbm %s1959_s12, 1024 }
  0x45   : > { %p1608_p1 = scmp.ne.s32.totalorder %s1959_s12, %s1607_s25  ;;  %p1609_p3 = pneg %p1967_p13 }
  0x46   : > { %s1612_s11 = scalar_lea.hbm %s2694_s0, 4096  ;;  %p1613_p9 = scmp.lt.u32.totalorder %s1959_s12, %s2694_s0 }
  0x47   : > { %p1610_p4 = pnand %p1609_p3, %p1608_p1  ;;  %p1614_p11 = scmp.lt.u32.totalorder %s1612_s11, %s1607_s25 }
  0x48   : > { %p1616_p2 = scmp.lt.u32.totalorder %s1607_s25, %s1959_s12 }
  0x49   : > { %p1611_p6 = pneg %p1610_p4  ;;  %p1615_p0 = por %p1614_p11, %p1613_p9 }
  0x4b   : > { %p1617_p5 = por %p1616_p2, %p1615_p0 }
  0x4d   : > { %p1618_p7 = pnand %p1617_p5, %p1611_p6 }
  0x4f   : > { %1621 = shalt.err (!%p1618_p7)
}
  0x50   : > { %s1622_s7 = scalar_lea.vmem %s1961_s22, 1024  ;;  %s1776_s8 = smov [#allocation2]  }
  0x51   : > { %p1623_p8 = scmp.ne.s32.totalorder %s1961_s22, %s1622_s7  ;;  %s1627_s10 = sshll.u32 %s1776_s8, 4  ;;  %s1628_s10 = int_to_ptr.vmem [resolvable:$false] %s1627_s10 }
  0x52   : > { %s1629_s21 = scalar_lea.vmem %s1628_s10, 2048  ;;  %p1630_p1 = scmp.lt.s32.totalorder %s1961_s22, %s1628_s10 }
  0x53   : > { %p1625_p10 = pnand %p1623_p8, %p1609_p3  ;;  %p1631_p4 = scmp.lt.s32.totalorder %s1629_s21, %s1622_s7 }
  0x55   : > { %p1626_p12 = pneg %p1625_p10  ;;  %p1632_p9 = por %p1631_p4, %p1630_p1 }
  0x57   : > { %p1633_p11 = pnand %p1632_p9, %p1626_p12 }
  0x59   : > { %1636 = shalt.err (!%p1633_p11)
}
  0x5a   : > { %1440 = dma.hbm_to_vmem [thread:$0]  (!%p1967_p13), %s1959_s12, 1024, %s1961_s22, %s169_s17  }
  0x5b   : > { %s2005_s6 = scalar_lea.hbm %s2695_s1, %s1403_s2  ;;  %s193_s7 = scalar_lea.vmem [#allocation5], %s1400_s4 }
  0x5c   : > { %s203_s8 = sshll.u32 %s193_s7, 4  ;;  %s190_s10 = scalar_lea.sflag [#allocation6], %s189_s9  ;;  %s204_s8 = int_to_ptr.vmem [resolvable:$true] %s203_s8 }
  0x5d   : > { %s1637_s21 = scalar_lea.hbm %s2005_s6, 512  ;;  %s1642_s27 = scalar_lea.hbm %s2695_s1, 2048 }
  0x5e   : > { %p1638_p6 = scmp.ne.s32.totalorder %s2005_s6, %s1637_s21  ;;  %p1643_p5 = scmp.lt.u32.totalorder %s2005_s6, %s2695_s1 }
  0x5f   : > { %p1644_p7 = scmp.lt.u32.totalorder %s1642_s27, %s1637_s21  ;;  %p1646_p10 = scmp.lt.u32.totalorder %s1637_s21, %s2005_s6 }
  0x60   : > { %p1640_p0 = pnand %p1638_p6, %p1609_p3 }
  0x61   : > { %p1645_p8 = por %p1644_p7, %p1643_p5 }
  0x62   : > { %p1641_p2 = pneg %p1640_p0 }
  0x63   : > { %p1647_p12 = por %p1646_p10, %p1645_p8 }
  0x65   : > { %p1648_p1 = pnand %p1647_p12, %p1641_p2 }
  0x67   : > { %1651 = shalt.err (!%p1648_p1)
}
  0x68   : > { %s1652_s9 = scalar_lea.vmem %s204_s8, 512  ;;  %s1777_s4 = smov [#allocation5]  }
  0x69   : > { %p1653_p4 = scmp.ne.s32.totalorder %s204_s8, %s1652_s9  ;;  %s1657_s17 = sshll.u32 %s1777_s4, 4  ;;  %s1658_s17 = int_to_ptr.vmem [resolvable:$false] %s1657_s17 }
  0x6a   : > { %s1659_s25 = scalar_lea.vmem %s1658_s17, 1024  ;;  %p1660_p6 = scmp.lt.s32.totalorder %s204_s8, %s1658_s17 }
  0x6b   : > { %p1655_p9 = pnand %p1653_p4, %p1609_p3  ;;  %p1661_p0 = scmp.lt.s32.totalorder %s1659_s25, %s1652_s9 }
  0x6d   : > { %p1656_p11 = pneg %p1655_p9  ;;  %p1662_p5 = por %p1661_p0, %p1660_p6 }
  0x6f   : > { %p1663_p7 = pnand %p1662_p5, %p1656_p11 }
  0x71   : > { %1666 = shalt.err (!%p1663_p7)
}
  0x72   : > { %1443 = dma.hbm_to_vmem [thread:$0]  (!%p1967_p13), %s2005_s6, 512, %s204_s8, %s190_s10  }
  0x73   : > { %p2732_p2 = scmp.ne.s32.totalorder %s2721_s26, 0 }
  0x75   : > { %212 = sbr.rel (%p2732_p2) target bundleno = 394 (0x18a), region = 32 }
  0x7c   : > { %s2033_s11 = sand.u32 1, %s1749_s13   ;;  %p2733_p3 = scmp.ne.s32.totalorder %s2717_s23, 0 }
  0x7d   : > { %s1405_s7 = sshll.u32 %s2033_s11, 6  ;;  %s215_s21 = scalar_lea.sflag [#allocation3], %s2033_s11 }
  0x7e   : > { %s2037_s12 = scalar_lea.vmem [#allocation2], %s1405_s7 }
  0x7f   : > { %1728 = dma.done.wait (%p2733_p3), %s215_s21, 1024  }
  0x80   : > { %1730 = vsyncadd (%p2733_p3), %s215_s21, 4294966272  ;;  %s223_s26 = sand.u32 1, %s1855_s20   ;;  %s1406_s29 = sshll.u32 %s2033_s11, 5 }
  0x81   : > { %s224_s6 = scalar_lea.sflag [#allocation6], %s223_s26  ;;  %s2047_s8 = scalar_lea.vmem [#allocation5], %s1406_s29 }
  0x82   : > { %1732 = dma.done.wait (%p2733_p3), %s224_s6, 512  }
  0x83   : > { %1734 = vsyncadd (%p2733_p3), %s224_s6, 4294966784  ;;  %p2734_p13 = scmp.eq.s32.totalorder %s1855_s20, 0 }
  0x85   : > { %1736 = dma.done.wait (%p2734_p13), [#allocation6], 128   ;;  %p2735_p8 = pmov %p2734_p13 }
  0x86   : > { %v1778_v0 = vmov 1   ;;  %v1779_v1 = vmov 0   ;;  %v274_v2 = vld [vmem:[#allocation7] sm:$0xff]  ;;  %v1780_v3 = vmov 2   ;;  %v1781_v4 = vmov 12   ;;  %v2063_v20 = vld [vmem:[%s2037_s12 + $0x8] sm:$0xff] }
  0x87   : > { %1738 = vsyncadd (%p2735_p8), [#allocation6], 4294967168  ;;  %1534 = vset.pattern.permute.xlu1 %v1778_v0  ;;  %1532 = vset.pattern.permute.xlu0 %v1779_v1  ;;  %v1782_v5 = vmov 3   ;;  %v1783_v6 = vmov 4   ;;  %v1784_v7 = vmov 5   ;;  %v1785_v8 = vmov 7  }
  0x88   : > { %333 = vperm.xlu1 %1534, %v274_v2   ;;  %281 = vperm.xlu0 %1532, %v274_v2   ;;  %v1786_v9 = vmov 6   ;;  %v1787_v10 = vmov 10   ;;  %v1788_v11 = vmov 8   ;;  %v1789_v12 = vmov 14   ;;  %v2060_v19 = vld [vmem:[%s2037_s12] sm:$0xff]  ;;  %v2066_v21 = vld [vmem:[%s2037_s12 + $0x10] sm:$0xff] }
  0x89   : > { %v1790_v13 = vmov 9   ;;  %v1791_v14 = vmov 11   ;;  %v1792_v15 = vmov 13   ;;  %v284_v16 = vlaneseq  ;;  %v2069_v22 = vld [vmem:[%s2037_s12 + $0x18] sm:$0xff]  ;;  %v2072_v23 = vld [vmem:[%s2037_s12 + $0x20] sm:$0xff]  ;;  %v2077_v25 = vld [vmem:[%s2037_s12 + $0x28] sm:$0xff] }
  0x8a   : > { %v2080_v26 = vld [vmem:[%s2037_s12 + $0x30] sm:$0xff]  ;;  %v2083_v27 = vld [vmem:[%s2037_s12 + $0x38] sm:$0xff]  ;;  %s1418_s20 = sshll.u32 %s1757_s15, 3  ;;  %s1419_s23 = sshll.u32 %s1761_s16, 4 }
  0x8b   : > { %v285_v17 = vshrl.u32 %v284_v16, 7  ;;  %s1265_s10 = sadd.s32 %s1419_s23, %s1418_s20  ;;  %s258_s15 = scalar_lea.vmem [#allocation8], %s1406_s29 }
  0x8c   : > { %1535 = vset.pattern.permute.xlu1 %v1780_v3  ;;  %1533 = vset.pattern.permute.xlu0 %v1781_v4  ;;  %s1420_s16 = sshll.u32 %s1265_s10, 6  ;;  %s1269_s22 = sshll.u32 %s258_s15, 4  ;;  %s2642_s22 = int_to_ptr.vmem [resolvable:$true] %s1269_s22 }
  0x8d   : > { %385 = vperm.xlu1 %1535, %v274_v2   ;;  %277 = vperm.xlu0 %1533, %v274_v2   ;;  %v2057_v18 = vsub.s32 1, %v285_v17  ;;  %v2074_v24 = vsub.s32 0, %v285_v17  ;;  %v2095_v33 = vsub.s32 2, %v285_v17  ;;  %v2111_v41 = vsub.s32 3, %v285_v17  ;;  %s2640_s2 = scalar_lea.hbm %s2697_s3, %s1420_s16  ;;  %s1253_s9 = scalar_lea.sflag [#allocation4], %s2033_s11 }
  0x8e   : > { %v2127_v49 = vsub.s32 4, %v285_v17  ;;  %v2143_v57 = vsub.s32 5, %v285_v17  ;;  %s1667_s4 = scalar_lea.vmem %s2642_s22, 512  ;;  %p2861_p12 = scmp.ne.s32.totalorder %s2718_s24, 0 }
  0x8f   : > { %2736 = vst [vmem:[#allocation17_spill] sm:$0xff] %v2074_v24  ;;  %v339_v28 = vrot.slane %v2060_v19, %v2057_v18  ;;  %v343_v29 = vrot.slane %v2063_v20, %v2057_v18  ;;  %v347_v30 = vrot.slane %v2066_v21, %v2057_v18  ;;  %p1668_p10 = scmp.ne.s32.totalorder %s2642_s22, %s1667_s4  ;;  %s1793_s17 = smov [#allocation8]  }
  0x90   : > { %s1671_s25 = sshll.u32 %s1793_s17, 4  ;;  %s1672_s25 = int_to_ptr.vmem [resolvable:$false] %s1671_s25 }
  0x91   : > { %1536 = vset.pattern.permute.xlu1 %v1782_v5  ;;  %1537 = vset.pattern.permute.xlu0 %v1783_v6  ;;  %v2167_v5 = vsub.s32 6, %v285_v17  ;;  %p1669_p1 = pnand %p1668_p10, %p2861_p12  ;;  %s1673_s7 = scalar_lea.vmem %s1672_s25, 1024 }
  0x92   : > { %437 = vperm.xlu1 %1536, %v274_v2   ;;  %489 = vperm.xlu0 %1537, %v274_v2   ;;  %p1674_p9 = scmp.lt.s32.totalorder %s2642_s22, %s1672_s25  ;;  %p1675_p11 = scmp.lt.s32.totalorder %s1673_s7, %s1667_s4 }
  0x93   : > { %p1670_p4 = pneg %p1669_p1 }
  0x94   : > { %p1676_p6 = por %p1675_p11, %p1674_p9 }
  0x96   : > { %1538 = vset.pattern.permute.xlu1 %v1784_v7  ;;  %1540 = vset.pattern.permute.xlu0 %v1785_v8  ;;  %v2227_v8 = vld [vmem:[%s2047_s8 + $0x18] sm:$0xff]  ;;  %p1677_p0 = pnand %p1676_p6, %p1670_p4 }
  0x97   : > { %541 = vperm.xlu1 %1538, %v274_v2   ;;  %645 = vperm.xlu0 %1540, %v274_v2   ;;  %2740 = vst [vmem:[#allocation21_spill] sm:$0xff] %v2227_v8  ;;  %v735_v4 = vrot.slane %v2227_v8, %v2127_v49  ;;  %v823_v61 = vrot.slane %v2227_v8, %v2057_v18 }
  0x98   : > { %v827_v60 = vrot.slane %v2227_v8, %v2143_v57  ;;  %v919_v51 = vrot.slane %v2227_v8, %v2167_v5  ;;  %v1007_v43 = vrot.slane %v2227_v8, %v2111_v41 }
  0x9a   : > { %v2392_v31 = vrot.slane %v1007_v43, %v2111_v41 }
  0x9b   : > { %1539 = vset.pattern.permute.xlu1 %v1786_v9  ;;  %1543 = vset.pattern.permute.xlu0 %v1787_v10  ;;  %v2210_v9 = vld [vmem:[%s2047_s8] sm:$0xff]  ;;  %v2224_v10 = vld [vmem:[%s2047_s8 + $0x10] sm:$0xff] }
  0x9c   : > { %593 = vperm.xlu1 %1539, %v274_v2   ;;  %885 = vperm.xlu0 %1543, %v274_v2   ;;  %2737 = vst [vmem:[#allocation18_spill] sm:$0xff] %v2210_v9  ;;  %2739 = vst [vmem:[#allocation20_spill] sm:$0xff] %v2224_v10  ;;  %v707_v16 = vrot.slane %v2210_v9, %v2074_v24  ;;  %v723_v7 = vrot.slane %v2224_v10, %v2074_v24 }
  0x9d   : > { %v799_v3 = vrot.slane %v2210_v9, %v2057_v18  ;;  %v815_v63 = vrot.slane %v2224_v10, %v2057_v18  ;;  %v819_v62 = vrot.slane %v2224_v10, %v2143_v57  ;;  %v983_v50 = vrot.slane %v2210_v9, %v2111_v41  ;;  %2766 = vst [vmem:[#allocation47_spill] sm:$0xff] %v2392_v31 }
  0x9e   : > { %v2270_v59 = vrot.slane %v707_v16, %v2074_v24  ;;  %v2282_v54 = vrot.slane %v723_v7, %v2074_v24  ;;  %v2291_v16 = vrot.slane %v735_v4, %v2074_v24  ;;  %v2312_v4 = vrot.slane %v823_v61, %v2057_v18 }
  0x9f   : > { %v911_v61 = vrot.slane %v2224_v10, %v2167_v5  ;;  %v999_v45 = vrot.slane %v2224_v10, %v2111_v41  ;;  %v2775_v31 = vrot.slane %v2066_v21, %v2074_v24 }
  0xa0   : > { %1541 = vset.pattern.permute.xlu1 %v1788_v11  ;;  %1546 = vset.pattern.permute.xlu0 %v1789_v12  ;;  %v711_v12 = vrot.slane %v2210_v9, %v2127_v49  ;;  %2743 = vst [vmem:[#allocation24_spill] sm:$0xff] %v2291_v16  ;;  %2750 = vst [vmem:[#allocation31_spill] sm:$0xff] %v2312_v4 }
  0xa1   : > { %697 = vperm.xlu1 %1541, %v274_v2   ;;  %1137 = vperm.xlu0 %1546, %v274_v2   ;;  %v2365_v35 = vrot.slane %v911_v61, %v2095_v33 }
  0xa2   : > { %v2273_v58 = vrot.slane %v711_v12, %v2074_v24  ;;  %v2294_v12 = vrot.slane %v799_v3, %v2057_v18  ;;  %v2315_v3 = vrot.slane %v827_v60, %v2057_v18  ;;  %v915_v60 = vrot.slane %v2227_v8, %v2095_v33 }
  0xa3   : > { %2757 = vst [vmem:[#allocation38_spill] sm:$0xff] %v2365_v35 }
  0xa4   : > { %2744 = vst [vmem:[#allocation25_spill] sm:$0xff] %v2294_v12  ;;  %2751 = vst [vmem:[#allocation32_spill] sm:$0xff] %v2315_v3  ;;  %v2368_v34 = vrot.slane %v915_v60, %v2095_v33  ;;  %v2386_v60 = vrot.slane %v999_v45, %v2111_v41 }
  0xa5   : > { %1542 = vset.pattern.permute.xlu1 %v1790_v13  ;;  %v2183_v13 = vsub.s32 7, %v285_v17  ;;  %v2213_v17 = vld [vmem:[%s2047_s8 + $0x8] sm:$0xff] }
  0xa6   : > { %793 = vperm.xlu1 %1542, %v274_v2   ;;  %2738 = vst [vmem:[#allocation19_spill] sm:$0xff] %v2213_v17  ;;  %v715_v6 = vrot.slane %v2213_v17, %v2074_v24  ;;  %v719_v11 = vrot.slane %v2213_v17, %v2127_v49  ;;  %v807_v1 = vrot.slane %v2213_v17, %v2057_v18  ;;  %2758 = vst [vmem:[#allocation39_spill] sm:$0xff] %v2368_v34 }
  0xa7   : > { %v811_v0 = vrot.slane %v2213_v17, %v2143_v57  ;;  %v987_v48 = vrot.slane %v2210_v9, %v2183_v13  ;;  %v991_v47 = vrot.slane %v2213_v17, %v2111_v41  ;;  %v995_v46 = vrot.slane %v2213_v17, %v2183_v13  ;;  %2764 = vst [vmem:[#allocation45_spill] sm:$0xff] %v2386_v60 }
  0xa8   : > { %v2276_v56 = vrot.slane %v715_v6, %v2074_v24  ;;  %v2279_v55 = vrot.slane %v719_v11, %v2074_v24  ;;  %v2300_v11 = vrot.slane %v807_v1, %v2057_v18  ;;  %v895_v1 = vrot.slane %v2210_v9, %v2167_v5 }
  0xa9   : > { %v2303_v7 = vrot.slane %v811_v0, %v2057_v18  ;;  %v899_v0 = vrot.slane %v2213_v17, %v2095_v33  ;;  %v1003_v44 = vrot.slane %v2224_v10, %v2183_v13  ;;  %v1011_v42 = vrot.slane %v2227_v8, %v2183_v13 }
  0xaa   : > { %1544 = vset.pattern.permute.xlu1 %v1791_v14  ;;  %v727_v14 = vrot.slane %v2224_v10, %v2127_v49  ;;  %2746 = vst [vmem:[#allocation27_spill] sm:$0xff] %v2300_v11  ;;  %v2353_v39 = vrot.slane %v895_v1, %v2095_v33  ;;  %v2383_v61 = vrot.slane %v995_v46, %v2111_v41 }
  0xab   : > { %977 = vperm.xlu1 %1544, %v274_v2   ;;  %2747 = vst [vmem:[#allocation28_spill] sm:$0xff] %v2303_v7  ;;  %v2356_v38 = vrot.slane %v899_v0, %v2095_v33  ;;  %v2374_v0 = vrot.slane %v983_v50, %v2111_v41  ;;  %v2395_v50 = vrot.slane %v1011_v42, %v2111_v41 }
  0xac   : > { %v2285_v53 = vrot.slane %v727_v14, %v2074_v24  ;;  %v2306_v14 = vrot.slane %v815_v63, %v2057_v18  ;;  %v903_v63 = vrot.slane %v2213_v17, %v2167_v5  ;;  %2753 = vst [vmem:[#allocation34_spill] sm:$0xff] %v2353_v39  ;;  %2763 = vst [vmem:[#allocation44_spill] sm:$0xff] %v2383_v61 }
  0xad   : > { %2754 = vst [vmem:[#allocation35_spill] sm:$0xff] %v2356_v38  ;;  %2760 = vst [vmem:[#allocation41_spill] sm:$0xff] %v2374_v0  ;;  %v2769_v42 = vrot.slane %v2072_v23, %v2057_v18  ;;  %v2772_v17 = vrot.slane %v2083_v27, %v2057_v18  ;;  %v2779_v60 = vrot.slane %v2080_v26, %v2074_v24 }
  0xae   : > { %2741 = vst [vmem:[#allocation22_spill] sm:$0xff] %v2285_v53  ;;  %2748 = vst [vmem:[#allocation29_spill] sm:$0xff] %v2306_v14  ;;  %v2359_v37 = vrot.slane %v903_v63, %v2095_v33  ;;  %v2377_v63 = vrot.slane %v987_v48, %v2111_v41  ;;  %v2780_v61 = vrot.slane %v2083_v27, %v2074_v24 }
  0xaf   : > { %1545 = vset.pattern.permute.xlu1 %v1792_v15  ;;  %v731_v15 = vrot.slane %v2227_v8, %v2074_v24  ;;  %2767 = vst [vmem:[#allocation48_spill] sm:$0xff] %v2395_v50  ;;  %v2770_v8 = vrot.slane %v2077_v25, %v2057_v18  ;;  %v2774_v50 = vrot.slane %v2063_v20, %v2074_v24 }
  0xb0   : > { %1077 = vperm.xlu1 %1545, %v274_v2   ;;  %v803_v2 = vrot.slane %v2210_v9, %v2143_v57  ;;  %2755 = vst [vmem:[#allocation36_spill] sm:$0xff] %v2359_v37  ;;  %2761 = vst [vmem:[#allocation42_spill] sm:$0xff] %v2377_v63  ;;  %v2788_v37 = vrot.slane %v2083_v27, %v2095_v33 }
  0xb1   : > { %v2288_v52 = vrot.slane %v731_v15, %v2074_v24  ;;  %v2309_v15 = vrot.slane %v819_v62, %v2057_v18  ;;  %v907_v62 = vrot.slane %v2224_v10, %v2095_v33  ;;  %v2771_v10 = vrot.slane %v2080_v26, %v2057_v18 }
  0xb2   : > { %v2297_v6 = vrot.slane %v803_v2, %v2057_v18  ;;  %v891_v2 = vrot.slane %v2210_v9, %v2095_v33  ;;  %v2773_v9 = vrot.slane %v2060_v19, %v2074_v24 }
  0xb3   : > { %2742 = vst [vmem:[#allocation23_spill] sm:$0xff] %v2288_v52  ;;  %2749 = vst [vmem:[#allocation30_spill] sm:$0xff] %v2309_v15  ;;  %v2362_v36 = vrot.slane %v907_v62, %v2095_v33  ;;  %v2380_v62 = vrot.slane %v991_v47, %v2111_v41 }
  0xb4   : > { %2745 = vst [vmem:[#allocation26_spill] sm:$0xff] %v2297_v6  ;;  %v2350_v40 = vrot.slane %v891_v2, %v2095_v33  ;;  %v2371_v2 = vrot.slane %v919_v51, %v2095_v33  ;;  %v2389_v51 = vrot.slane %v1003_v44, %v2111_v41  ;;  %v2768_v44 = vrot.slane %v2069_v22, %v2057_v18 }
  0xb5   : > { %2756 = vst [vmem:[#allocation37_spill] sm:$0xff] %v2362_v36  ;;  %2762 = vst [vmem:[#allocation43_spill] sm:$0xff] %v2380_v62  ;;  %v2777_v18 = vrot.slane %v2072_v23, %v2074_v24  ;;  %v2787_v36 = vrot.slane %v2080_v26, %v2095_v33 }
  0xb6   : > { %2752 = vst [vmem:[#allocation33_spill] sm:$0xff] %v2350_v40  ;;  %2759 = vst [vmem:[#allocation40_spill] sm:$0xff] %v2371_v2 }
  0xb7   : > { %2765 = vst [vmem:[#allocation46_spill] sm:$0xff] %v2389_v51  ;;  %v2776_v51 = vrot.slane %v2069_v22, %v2074_v24 }
 0x107   : > { %v334_v1 = vpop.permute.xlu1 %333  ;;  %v282_v32 = vpop.permute.xlu0 %281 }
 0x108   : > { %v368_v47 = vmul.f32 %v339_v28, %v334_v1  ;;  %v369_v46 = vmul.f32 %v343_v29, %v334_v1  ;;  %v370_v45 = vmul.f32 %v347_v30, %v334_v1  ;;  %v371_v43 = vmul.f32 %v2768_v44, %v334_v1 }
 0x109   : > { %v372_v48 = vmul.f32 %v2769_v42, %v334_v1  ;;  %v373_v28 = vmul.f32 %v2770_v8, %v334_v1  ;;  %v374_v29 = vmul.f32 %v2771_v10, %v334_v1  ;;  %v375_v30 = vmul.f32 %v2772_v17, %v334_v1 }
 0x10a   : > { %v316_v44 = vmul.f32 %v2773_v9, %v282_v32  ;;  %v317_v42 = vmul.f32 %v2774_v50, %v282_v32  ;;  %v318_v8 = vmul.f32 %v2775_v31, %v282_v32  ;;  %v319_v10 = vmul.f32 %v2776_v51, %v282_v32 }
 0x10b   : > { %v320_v17 = vmul.f32 %v2777_v18, %v282_v32  ;;  %v2778_v1 = vrot.slane %v2077_v25, %v2074_v24  ;;  %v322_v50 = vmul.f32 %v2779_v60, %v282_v32  ;;  %v323_v31 = vmul.f32 %v2780_v61, %v282_v32 }
 0x10c   : > { %v386_v62 = vpop.permute.xlu1 %385  ;;  %v278_v63 = vpop.permute.xlu0 %277  ;;  %v2781_v51 = vrot.slane %v2060_v19, %v2095_v33  ;;  %v2782_v18 = vrot.slane %v2063_v20, %v2095_v33  ;;  %v2784_v60 = vrot.slane %v2069_v22, %v2095_v33  ;;  %v2786_v24 = vrot.slane %v2077_v25, %v2095_v33 }
 0x10d   : > { %v321_v9 = vmul.f32 %v2778_v1, %v282_v32  ;;  %v2783_v1 = vrot.slane %v2066_v21, %v2095_v33  ;;  %v2785_v32 = vrot.slane %v2072_v23, %v2095_v33  ;;  %v324_v38 = vadd.f32 %v316_v44, %v278_v63 }
 0x10e   : > { %v420_v0 = vmul.f32 %v2781_v51, %v386_v62  ;;  %v421_v2 = vmul.f32 %v2782_v18, %v386_v62  ;;  %v423_v35 = vmul.f32 %v2784_v60, %v386_v62  ;;  %v425_v51 = vmul.f32 %v2786_v24, %v386_v62 }
 0x10f   : > { %v422_v34 = vmul.f32 %v2783_v1, %v386_v62  ;;  %v424_v61 = vmul.f32 %v2785_v32, %v386_v62  ;;  %v426_v18 = vmul.f32 %v2787_v36, %v386_v62  ;;  %v427_v1 = vmul.f32 %v2788_v37, %v386_v62 }
 0x110   : > { %v325_v39 = vadd.f32 %v317_v42, %v278_v63  ;;  %v326_v40 = vadd.f32 %v318_v8, %v278_v63  ;;  %v327_v60 = vadd.f32 %v319_v10, %v278_v63  ;;  %v328_v3 = vadd.f32 %v320_v17, %v278_v63 }
 0x111   : > { %v329_v4 = vadd.f32 %v321_v9, %v278_v63  ;;  %v330_v15 = vadd.f32 %v322_v50, %v278_v63  ;;  %v331_v32 = vadd.f32 %v323_v31, %v278_v63  ;;  %v376_v14 = vadd.f32 %v368_v47, %v324_v38  ;;  %v438_v52 = vpop.permute.xlu1 %437 }
 0x112   : > { %v377_v7 = vadd.f32 %v369_v46, %v325_v39  ;;  %v378_v11 = vadd.f32 %v370_v45, %v326_v40  ;;  %v379_v24 = vadd.f32 %v371_v43, %v327_v60  ;;  %v380_v6 = vadd.f32 %v372_v48, %v328_v3 }
 0x113   : > { %v381_v12 = vadd.f32 %v373_v28, %v329_v4  ;;  %v382_v16 = vadd.f32 %v374_v29, %v330_v15  ;;  %v383_v36 = vadd.f32 %v375_v30, %v331_v32  ;;  %v428_v53 = vadd.f32 %v420_v0, %v376_v14  ;;  %v490_v0 = vpop.permute.xlu0 %489 }
 0x114   : > { %v429_v33 = vadd.f32 %v421_v2, %v377_v7  ;;  %v430_v37 = vadd.f32 %v422_v34, %v378_v11  ;;  %v431_v62 = vadd.f32 %v423_v35, %v379_v24  ;;  %v432_v44 = vadd.f32 %v424_v61, %v380_v6 }
 0x115   : > { %v433_v42 = vadd.f32 %v425_v51, %v381_v12  ;;  %v434_v8 = vadd.f32 %v426_v18, %v382_v16  ;;  %v435_v10 = vadd.f32 %v427_v1, %v383_v36  ;;  %v2789_v63 = vrot.slane %v2060_v19, %v2111_v41 }
 0x116   : > { %v2790_v39 = vrot.slane %v2063_v20, %v2111_v41  ;;  %v2791_v15 = vrot.slane %v2066_v21, %v2111_v41  ;;  %v2792_v34 = vrot.slane %v2069_v22, %v2111_v41  ;;  %v2793_v16 = vrot.slane %v2072_v23, %v2111_v41  ;;  %v542_v17 = vpop.permute.xlu1 %541 }
 0x117   : > { %v472_v38 = vmul.f32 %v2789_v63, %v438_v52  ;;  %v2794_v6 = vrot.slane %v2077_v25, %v2111_v41  ;;  %v2795_v7 = vrot.slane %v2080_v26, %v2111_v41  ;;  %v2796_v3 = vrot.slane %v2083_v27, %v2111_v41 }
 0x118   : > { %v473_v40 = vmul.f32 %v2790_v39, %v438_v52  ;;  %v474_v4 = vmul.f32 %v2791_v15, %v438_v52  ;;  %v475_v35 = vmul.f32 %v2792_v34, %v438_v52  ;;  %v476_v12 = vmul.f32 %v2793_v16, %v438_v52 }
 0x119   : > { %v477_v11 = vmul.f32 %v2794_v6, %v438_v52  ;;  %v478_v14 = vmul.f32 %v2795_v7, %v438_v52  ;;  %v479_v2 = vmul.f32 %v2796_v3, %v438_v52  ;;  %v480_v47 = vadd.f32 %v472_v38, %v428_v53 }
 0x11a   : > { %v481_v46 = vadd.f32 %v473_v40, %v429_v33  ;;  %v482_v45 = vadd.f32 %v474_v4, %v430_v37  ;;  %v483_v43 = vadd.f32 %v475_v35, %v431_v62  ;;  %v484_v48 = vadd.f32 %v476_v12, %v432_v44 }
 0x11b   : > { %v485_v28 = vadd.f32 %v477_v11, %v433_v42  ;;  %v486_v29 = vadd.f32 %v478_v14, %v434_v8  ;;  %v487_v30 = vadd.f32 %v479_v2, %v435_v10  ;;  %v2797_v9 = vrot.slane %v2060_v19, %v2127_v49 }
 0x11c   : > { %v2798_v31 = vrot.slane %v2063_v20, %v2127_v49  ;;  %v2799_v41 = vrot.slane %v2066_v21, %v2127_v49  ;;  %v2800_v53 = vrot.slane %v2069_v22, %v2127_v49  ;;  %v2801_v18 = vrot.slane %v2072_v23, %v2127_v49 }
 0x11d   : > { %v524_v50 = vmul.f32 %v2797_v9, %v490_v0  ;;  %v2802_v60 = vrot.slane %v2077_v25, %v2127_v49  ;;  %v2803_v24 = vrot.slane %v2080_v26, %v2127_v49  ;;  %v2804_v33 = vrot.slane %v2083_v27, %v2127_v49 }
 0x11e   : > { %v525_v61 = vmul.f32 %v2798_v31, %v490_v0  ;;  %v526_v52 = vmul.f32 %v2799_v41, %v490_v0  ;;  %v527_v51 = vmul.f32 %v2800_v53, %v490_v0  ;;  %v528_v1 = vmul.f32 %v2801_v18, %v490_v0 }
 0x11f   : > { %v529_v32 = vmul.f32 %v2802_v60, %v490_v0  ;;  %v530_v36 = vmul.f32 %v2803_v24, %v490_v0  ;;  %v531_v37 = vmul.f32 %v2804_v33, %v490_v0  ;;  %v532_v62 = vadd.f32 %v524_v50, %v480_v47 }
 0x120   : > { %v533_v44 = vadd.f32 %v525_v61, %v481_v46  ;;  %v534_v42 = vadd.f32 %v526_v52, %v482_v45  ;;  %v535_v8 = vadd.f32 %v527_v51, %v483_v43  ;;  %v536_v10 = vadd.f32 %v528_v1, %v484_v48  ;;  %v594_v46 = vpop.permute.xlu1 %593 }
 0x121   : > { %v537_v63 = vadd.f32 %v529_v32, %v485_v28  ;;  %v538_v38 = vadd.f32 %v530_v36, %v486_v29  ;;  %v539_v39 = vadd.f32 %v531_v37, %v487_v30  ;;  %v2805_v40 = vrot.slane %v2060_v19, %v2143_v57 }
 0x122   : > { %v2806_v4 = vrot.slane %v2063_v20, %v2143_v57  ;;  %v2807_v49 = vrot.slane %v2066_v21, %v2143_v57  ;;  %v2808_v16 = vrot.slane %v2069_v22, %v2143_v57  ;;  %v2809_v6 = vrot.slane %v2072_v23, %v2143_v57 }
 0x123   : > { %v576_v15 = vmul.f32 %v2805_v40, %v542_v17  ;;  %v2810_v7 = vrot.slane %v2077_v25, %v2143_v57  ;;  %v2811_v3 = vrot.slane %v2080_v26, %v2143_v57  ;;  %v2812_v0 = vrot.slane %v2083_v27, %v2143_v57 }
 0x124   : > { %v577_v34 = vmul.f32 %v2806_v4, %v542_v17  ;;  %v578_v35 = vmul.f32 %v2807_v49, %v542_v17  ;;  %v579_v12 = vmul.f32 %v2808_v16, %v542_v17  ;;  %v580_v11 = vmul.f32 %v2809_v6, %v542_v17 }
 0x125   : > { %v581_v14 = vmul.f32 %v2810_v7, %v542_v17  ;;  %v582_v2 = vmul.f32 %v2811_v3, %v542_v17  ;;  %v583_v47 = vmul.f32 %v2812_v0, %v542_v17  ;;  %v584_v45 = vadd.f32 %v576_v15, %v532_v62  ;;  %v646_v62 = vpop.permute.xlu0 %645  ;;  %v698_v15 = vpop.permute.xlu1 %697 }
 0x126   : > { %v585_v43 = vadd.f32 %v577_v34, %v533_v44  ;;  %v586_v48 = vadd.f32 %v578_v35, %v534_v42  ;;  %v587_v28 = vadd.f32 %v579_v12, %v535_v8  ;;  %v588_v29 = vadd.f32 %v580_v11, %v536_v10 }
 0x127   : > { %v589_v30 = vadd.f32 %v581_v14, %v537_v63  ;;  %v590_v9 = vadd.f32 %v582_v2, %v538_v38  ;;  %v591_v50 = vadd.f32 %v583_v47, %v539_v39  ;;  %v2813_v31 = vrot.slane %v2060_v19, %v2167_v5 }
 0x128   : > { %v2814_v41 = vrot.slane %v2063_v20, %v2167_v5  ;;  %v2815_v57 = vrot.slane %v2066_v21, %v2167_v5  ;;  %v2816_v53 = vrot.slane %v2069_v22, %v2167_v5  ;;  %v2817_v18 = vrot.slane %v2072_v23, %v2167_v5 }
 0x129   : > { %v628_v61 = vmul.f32 %v2813_v31, %v594_v46  ;;  %v2818_v60 = vrot.slane %v2077_v25, %v2167_v5  ;;  %v2819_v24 = vrot.slane %v2080_v26, %v2167_v5  ;;  %v2820_v33 = vrot.slane %v2083_v27, %v2167_v5  ;;  %v2831_v31 = vld [vmem:[#allocation24_spill] sm:$0xff] }
 0x12a   : > { %v629_v52 = vmul.f32 %v2814_v41, %v594_v46  ;;  %v630_v17 = vmul.f32 %v2815_v57, %v594_v46  ;;  %v631_v51 = vmul.f32 %v2816_v53, %v594_v46  ;;  %v632_v1 = vmul.f32 %v2817_v18, %v594_v46  ;;  %v794_v41 = vpop.permute.xlu1 %793 }
 0x12b   : > { %v633_v32 = vmul.f32 %v2818_v60, %v594_v46  ;;  %v634_v36 = vmul.f32 %v2819_v24, %v594_v46  ;;  %v635_v37 = vmul.f32 %v2820_v33, %v594_v46  ;;  %v636_v44 = vadd.f32 %v628_v61, %v584_v45  ;;  %v2835_v24 = vld [vmem:[#allocation28_spill] sm:$0xff]  ;;  %v2836_v33 = vld [vmem:[#allocation29_spill] sm:$0xff] }
 0x12c   : > { %v637_v42 = vadd.f32 %v629_v52, %v585_v43  ;;  %v638_v8 = vadd.f32 %v630_v17, %v586_v48  ;;  %v639_v10 = vadd.f32 %v631_v51, %v587_v28  ;;  %v640_v63 = vadd.f32 %v632_v1, %v588_v29 }
 0x12d   : > { %v641_v38 = vadd.f32 %v633_v32, %v589_v30  ;;  %v642_v39 = vadd.f32 %v634_v36, %v590_v9  ;;  %v643_v40 = vadd.f32 %v635_v37, %v591_v50  ;;  %v2821_v4 = vrot.slane %v2060_v19, %v2183_v13  ;;  %v2830_v9 = vld [vmem:[#allocation23_spill] sm:$0xff] }
 0x12e   : > { %v2822_v49 = vrot.slane %v2063_v20, %v2183_v13  ;;  %v2823_v5 = vrot.slane %v2066_v21, %v2183_v13  ;;  %v2824_v12 = vrot.slane %v2069_v22, %v2183_v13  ;;  %v2825_v11 = vrot.slane %v2072_v23, %v2183_v13 }
 0x12f   : > { %v680_v34 = vmul.f32 %v2821_v4, %v646_v62  ;;  %v2826_v19 = vrot.slane %v2077_v25, %v2183_v13  ;;  %v2827_v20 = vrot.slane %v2080_v26, %v2183_v13  ;;  %v2828_v21 = vrot.slane %v2083_v27, %v2183_v13  ;;  %v2829_v27 = vld [vmem:[#allocation22_spill] sm:$0xff] }
 0x130   : > { %v681_v35 = vmul.f32 %v2822_v49, %v646_v62  ;;  %v682_v16 = vmul.f32 %v2823_v5, %v646_v62  ;;  %v683_v6 = vmul.f32 %v2824_v12, %v646_v62  ;;  %v684_v7 = vmul.f32 %v2825_v11, %v646_v62  ;;  %v2840_v12 = vld [vmem:[#allocation33_spill] sm:$0xff]  ;;  %v2841_v11 = vld [vmem:[#allocation34_spill] sm:$0xff] }
 0x131   : > { %v685_v14 = vmul.f32 %v2826_v19, %v646_v62  ;;  %v686_v3 = vmul.f32 %v2827_v20, %v646_v62  ;;  %v687_v2 = vmul.f32 %v2828_v21, %v646_v62  ;;  %v688_v0 = vadd.f32 %v680_v34, %v636_v44  ;;  %v2837_v62 = vld [vmem:[#allocation30_spill] sm:$0xff]  ;;  %v2842_v19 = vld [vmem:[#allocation35_spill] sm:$0xff]  ;;  %v2843_v20 = vld [vmem:[#allocation36_spill] sm:$0xff] }
 0x132   : > { %v689_v47 = vadd.f32 %v681_v35, %v637_v42  ;;  %v690_v22 = vadd.f32 %v682_v16, %v638_v8  ;;  %v691_v46 = vadd.f32 %v683_v6, %v639_v10  ;;  %v692_v45 = vadd.f32 %v684_v7, %v640_v63  ;;  %v2838_v42 = vld [vmem:[#allocation31_spill] sm:$0xff]  ;;  %v2839_v10 = vld [vmem:[#allocation32_spill] sm:$0xff]  ;;  %v978_v16 = vpop.permute.xlu1 %977  ;;  %v2844_v21 = vld [vmem:[#allocation37_spill] sm:$0xff] }
 0x133   : > { %v693_v43 = vadd.f32 %v685_v14, %v641_v38  ;;  %v694_v23 = vadd.f32 %v686_v3, %v642_v39  ;;  %v695_v48 = vadd.f32 %v687_v2, %v643_v40  ;;  %v776_v28 = vmul.f32 %v2270_v59, %v698_v15  ;;  %v886_v38 = vpop.permute.xlu0 %885 }
 0x134   : > { %v777_v25 = vmul.f32 %v2273_v58, %v698_v15  ;;  %v778_v29 = vmul.f32 %v2276_v56, %v698_v15  ;;  %v779_v26 = vmul.f32 %v2279_v55, %v698_v15  ;;  %v780_v30 = vmul.f32 %v2282_v54, %v698_v15  ;;  %v2832_v56 = vld [vmem:[#allocation25_spill] sm:$0xff]  ;;  %v2833_v55 = vld [vmem:[#allocation26_spill] sm:$0xff]  ;;  %v2834_v54 = vld [vmem:[#allocation27_spill] sm:$0xff] }
 0x135   : > { %v781_v13 = vmul.f32 %v2829_v27, %v698_v15  ;;  %v782_v50 = vmul.f32 %v2830_v9, %v698_v15  ;;  %v783_v61 = vmul.f32 %v2831_v31, %v698_v15  ;;  %v784_v52 = vadd.f32 %v776_v28, %v688_v0  ;;  %v2845_v0 = vld [vmem:[#allocation38_spill] sm:$0xff] }
 0x136   : > { %v785_v57 = vadd.f32 %v777_v25, %v689_v47  ;;  %v786_v17 = vadd.f32 %v778_v29, %v690_v22  ;;  %v787_v53 = vadd.f32 %v779_v26, %v691_v46  ;;  %v788_v59 = vadd.f32 %v780_v30, %v692_v45  ;;  %v2846_v22 = vld [vmem:[#allocation39_spill] sm:$0xff]  ;;  %v2847_v45 = vld [vmem:[#allocation40_spill] sm:$0xff]  ;;  %v2849_v28 = vld [vmem:[#allocation42_spill] sm:$0xff] }
 0x137   : > { %v789_v51 = vadd.f32 %v781_v13, %v693_v43  ;;  %v790_v58 = vadd.f32 %v782_v50, %v694_v23  ;;  %v791_v18 = vadd.f32 %v783_v61, %v695_v48  ;;  %v868_v1 = vmul.f32 %v2832_v56, %v794_v41  ;;  %v2848_v23 = vld [vmem:[#allocation41_spill] sm:$0xff]  ;;  %v2850_v29 = vld [vmem:[#allocation43_spill] sm:$0xff]  ;;  %v2851_v30 = vld [vmem:[#allocation44_spill] sm:$0xff] }
 0x138   : > { %v869_v60 = vmul.f32 %v2833_v55, %v794_v41  ;;  %v870_v32 = vmul.f32 %v2834_v54, %v794_v41  ;;  %v871_v36 = vmul.f32 %v2835_v24, %v794_v41  ;;  %v872_v37 = vmul.f32 %v2836_v33, %v794_v41  ;;  %v2852_v13 = vld [vmem:[#allocation45_spill] sm:$0xff]  ;;  %v2853_v50 = vld [vmem:[#allocation46_spill] sm:$0xff]  ;;  %v2854_v61 = vld [vmem:[#allocation47_spill] sm:$0xff]  ;;  %v1078_v24 = vpop.permute.xlu1 %1077 }
 0x139   : > { %v873_v44 = vmul.f32 %v2837_v62, %v794_v41  ;;  %v874_v8 = vmul.f32 %v2838_v42, %v794_v41  ;;  %v875_v63 = vmul.f32 %v2839_v10, %v794_v41  ;;  %v876_v39 = vadd.f32 %v868_v1, %v784_v52  ;;  %v2855_v52 = vld [vmem:[#allocation48_spill] sm:$0xff] }
 0x13a   : > { %v877_v40 = vadd.f32 %v869_v60, %v785_v57  ;;  %v878_v15 = vadd.f32 %v870_v32, %v786_v17  ;;  %v879_v4 = vadd.f32 %v871_v36, %v787_v53  ;;  %v880_v34 = vadd.f32 %v872_v37, %v788_v59 }
 0x13b   : > { %v881_v49 = vadd.f32 %v873_v44, %v789_v51  ;;  %v882_v35 = vadd.f32 %v874_v8, %v790_v58  ;;  %v883_v5 = vadd.f32 %v875_v63, %v791_v18  ;;  %v960_v6 = vmul.f32 %v2840_v12, %v886_v38 }
 0x13c   : > { %v961_v7 = vmul.f32 %v2841_v11, %v886_v38  ;;  %v962_v14 = vmul.f32 %v2842_v19, %v886_v38  ;;  %v963_v3 = vmul.f32 %v2843_v20, %v886_v38  ;;  %v964_v2 = vmul.f32 %v2844_v21, %v886_v38 }
 0x13d   : > { %v965_v47 = vmul.f32 %v2845_v0, %v886_v38  ;;  %v966_v46 = vmul.f32 %v2846_v22, %v886_v38  ;;  %v967_v43 = vmul.f32 %v2847_v45, %v886_v38  ;;  %v1052_v48 = vmul.f32 %v2848_v23, %v978_v16 }
 0x13e   : > { %v1053_v25 = vmul.f32 %v2849_v28, %v978_v16  ;;  %v1054_v26 = vmul.f32 %v2850_v29, %v978_v16  ;;  %v1055_v27 = vmul.f32 %v2851_v30, %v978_v16  ;;  %v1056_v9 = vmul.f32 %v2852_v13, %v978_v16 }
 0x13f   : > { %v1057_v31 = vmul.f32 %v2853_v50, %v978_v16  ;;  %v1058_v41 = vmul.f32 %v2854_v61, %v978_v16  ;;  %v1059_v57 = vmul.f32 %v2855_v52, %v978_v16  ;;  %v968_v17 = vadd.f32 %v960_v6, %v876_v39 }
 0x140   : > { %v969_v53 = vadd.f32 %v961_v7, %v877_v40  ;;  %v970_v59 = vadd.f32 %v962_v14, %v878_v15  ;;  %v971_v51 = vadd.f32 %v963_v3, %v879_v4  ;;  %v972_v58 = vadd.f32 %v964_v2, %v880_v34 }
 0x141   : > { %v973_v18 = vadd.f32 %v965_v47, %v881_v49  ;;  %v974_v56 = vadd.f32 %v966_v46, %v882_v35  ;;  %v975_v1 = vadd.f32 %v967_v43, %v883_v5  ;;  %v1060_v55 = vadd.f32 %v1052_v48, %v968_v17 }
 0x142   : > { %v1061_v60 = vadd.f32 %v1053_v25, %v969_v53  ;;  %v1062_v54 = vadd.f32 %v1054_v26, %v970_v59  ;;  %v1063_v32 = vadd.f32 %v1055_v27, %v971_v51  ;;  %v1064_v36 = vadd.f32 %v1056_v9, %v972_v58 }
 0x143   : > { %v1065_v33 = vadd.f32 %v1057_v31, %v973_v18  ;;  %v1066_v37 = vadd.f32 %v1058_v41, %v974_v56  ;;  %v1067_v62 = vadd.f32 %v1059_v57, %v975_v1  ;;  %v1068_v44 = vmax.f32 %v1060_v55, 0.0  ;;  %v1138_v18 = vpop.permute.xlu0 %1137 }
 0x144   : > { %v1069_v42 = vmax.f32 %v1061_v60, 0.0  ;;  %v1070_v8 = vmax.f32 %v1062_v54, 0.0  ;;  %v1071_v10 = vmax.f32 %v1063_v32, 0.0  ;;  %v1072_v63 = vmax.f32 %v1064_v36, 0.0 }
 0x145   : > { %v1073_v38 = vmax.f32 %v1065_v33, 0.0  ;;  %v1074_v39 = vmax.f32 %v1066_v37, 0.0  ;;  %v1075_v40 = vmax.f32 %v1067_v62, 0.0  ;;  %v1080_v15 = vmul.f32 %v1078_v24, %v1068_v44 }
 0x146   : > { %v1081_v4 = vmul.f32 %v1078_v24, %v1069_v42  ;;  %v1082_v34 = vmul.f32 %v1078_v24, %v1070_v8  ;;  %v1083_v49 = vmul.f32 %v1078_v24, %v1071_v10  ;;  %v1084_v35 = vmul.f32 %v1078_v24, %v1072_v63 }
 0x147   : > { %v1085_v5 = vmul.f32 %v1078_v24, %v1073_v38  ;;  %v1086_v16 = vmul.f32 %v1078_v24, %v1074_v39  ;;  %v1087_v12 = vmul.f32 %v1078_v24, %v1075_v40  ;;  %v1088_v6 = vrot.slane %v1080_v15, 4 }
 0x148   : > { %v1094_v11 = vrot.slane %v1081_v4, 4  ;;  %v1100_v7 = vrot.slane %v1082_v34, 4  ;;  %v1106_v19 = vrot.slane %v1083_v49, 4  ;;  %v1112_v14 = vrot.slane %v1084_v35, 4 }
 0x149   : > { %v1118_v20 = vrot.slane %v1085_v5, 4  ;;  %v1124_v3 = vrot.slane %v1086_v16, 4  ;;  %v1130_v21 = vrot.slane %v1087_v12, 4  ;;  %v1089_v2 = vadd.f32 %v1088_v6, %v1080_v15 }
 0x14a   : > { %v1095_v0 = vadd.f32 %v1094_v11, %v1081_v4  ;;  %v1101_v47 = vadd.f32 %v1100_v7, %v1082_v34  ;;  %v1107_v22 = vadd.f32 %v1106_v19, %v1083_v49  ;;  %v1113_v46 = vadd.f32 %v1112_v14, %v1084_v35 }
 0x14b   : > { %v1119_v45 = vadd.f32 %v1118_v20, %v1085_v5  ;;  %v1125_v43 = vadd.f32 %v1124_v3, %v1086_v16  ;;  %v1131_v23 = vadd.f32 %v1130_v21, %v1087_v12  ;;  %v1090_v48 = vrot.slane %v1089_v2, 2 }
 0x14c   : > { %v1096_v28 = vrot.slane %v1095_v0, 2  ;;  %v1102_v25 = vrot.slane %v1101_v47, 2  ;;  %v1108_v29 = vrot.slane %v1107_v22, 2  ;;  %v1114_v26 = vrot.slane %v1113_v46, 2 }
 0x14d   : > { %v1120_v30 = vrot.slane %v1119_v45, 2  ;;  %v1126_v27 = vrot.slane %v1125_v43, 2  ;;  %v1132_v13 = vrot.slane %v1131_v23, 2  ;;  %v1091_v9 = vadd.f32 %v1090_v48, %v1089_v2 }
 0x14e   : > { %v1097_v50 = vadd.f32 %v1096_v28, %v1095_v0  ;;  %v1103_v31 = vadd.f32 %v1102_v25, %v1101_v47  ;;  %v1109_v61 = vadd.f32 %v1108_v29, %v1107_v22  ;;  %v1115_v41 = vadd.f32 %v1114_v26, %v1113_v46  ;;  %v2856_v29 = vld [vmem:[#allocation17_spill] sm:$0xff] }
 0x14f   : > { %v1121_v52 = vadd.f32 %v1120_v30, %v1119_v45  ;;  %v1127_v57 = vadd.f32 %v1126_v27, %v1125_v43  ;;  %v1133_v17 = vadd.f32 %v1132_v13, %v1131_v23  ;;  %v1092_v53 = vrot.slane %v1091_v9, 1 }
 0x150   : > { %v1098_v59 = vrot.slane %v1097_v50, 1  ;;  %v1104_v51 = vrot.slane %v1103_v31, 1  ;;  %v1110_v58 = vrot.slane %v1109_v61, 1  ;;  %v1116_v56 = vrot.slane %v1115_v41, 1 }
 0x151   : > { %v1122_v1 = vrot.slane %v1121_v52, 1  ;;  %v1128_v55 = vrot.slane %v1127_v57, 1  ;;  %v1134_v60 = vrot.slane %v1133_v17, 1  ;;  %v1093_v54 = vadd.f32 %v1092_v53, %v1091_v9 }
 0x152   : > { %v1099_v32 = vadd.f32 %v1098_v59, %v1097_v50  ;;  %v1105_v24 = vadd.f32 %v1104_v51, %v1103_v31  ;;  %v1111_v36 = vadd.f32 %v1110_v58, %v1109_v61  ;;  %v1117_v33 = vadd.f32 %v1116_v56, %v1115_v41  ;;  %v2857_v59 = vld [vmem:[#allocation18_spill] sm:$0xff] }
 0x153   : > { %v1123_v37 = vadd.f32 %v1122_v1, %v1121_v52  ;;  %v1129_v62 = vadd.f32 %v1128_v55, %v1127_v57  ;;  %v1135_v44 = vadd.f32 %v1134_v60, %v1133_v17  ;;  %v1140_v42 = vadd.f32 %v1138_v18, %v1093_v54  ;;  %v2858_v55 = vld [vmem:[#allocation19_spill] sm:$0xff] }
 0x154   : > { %v1141_v8 = vadd.f32 %v1138_v18, %v1099_v32  ;;  %v1142_v10 = vadd.f32 %v1138_v18, %v1105_v24  ;;  %v1143_v63 = vadd.f32 %v1138_v18, %v1111_v36  ;;  %v1144_v38 = vadd.f32 %v1138_v18, %v1117_v33  ;;  %v2859_v32 = vld [vmem:[#allocation20_spill] sm:$0xff]  ;;  %v2860_v36 = vld [vmem:[#allocation21_spill] sm:$0xff] }
 0x155   : > { %v1145_v39 = vadd.f32 %v1138_v18, %v1123_v37  ;;  %v1146_v40 = vadd.f32 %v1138_v18, %v1129_v62  ;;  %v1409_v15 = vmul.f32 -1.442695, %v1140_v42  ;;  %v1147_v49 = vadd.f32 %v1138_v18, %v1135_v44 }
 0x156   : > { %v1410_v4 = vmul.f32 -1.442695, %v1141_v8  ;;  %v1411_v34 = vmul.f32 -1.442695, %v1142_v10  ;;  %v1412_v35 = vmul.f32 -1.442695, %v1143_v63 }
 0x157   : > { %1547 = vpow2.f32 %v1409_v15  ;;  %v1413_v5 = vmul.f32 -1.442695, %v1144_v38  ;;  %v1414_v16 = vmul.f32 -1.442695, %v1145_v39  ;;  %v1415_v12 = vmul.f32 -1.442695, %v1146_v40 }
 0x158   : > { %1549 = vpow2.f32 %v1410_v4  ;;  %v1416_v6 = vmul.f32 -1.442695, %v1147_v49 }
 0x159   : > { %1551 = vpow2.f32 %v1411_v34 }
 0x15a   : > { %1553 = vpow2.f32 %v1412_v35 }
 0x15b   : > { %1555 = vpow2.f32 %v1413_v5 }
 0x15c   : > { %1557 = vpow2.f32 %v1414_v16 }
 0x15d   : > { %1559 = vpow2.f32 %v1415_v12 }
 0x15e   : > { %1561 = vpow2.f32 %v1416_v6 }
 0x161   : > { %v1548_v11 = vpop.eup %1547 }
 0x162   : > { %v1550_v7 = vpop.eup %1549  ;;  %v1172_v19 = vadd.f32 1.0, %v1548_v11 }
 0x163   : > { %v1552_v14 = vpop.eup %1551  ;;  %v1173_v20 = vadd.f32 1.0, %v1550_v7 }
 0x164   : > { %v1554_v3 = vpop.eup %1553  ;;  %v1174_v21 = vadd.f32 1.0, %v1552_v14  ;;  %1563 = vrcp.f32 %v1172_v19 }
 0x165   : > { %v1556_v2 = vpop.eup %1555  ;;  %v1175_v0 = vadd.f32 1.0, %v1554_v3  ;;  %1565 = vrcp.f32 %v1173_v20 }
 0x166   : > { %v1558_v47 = vpop.eup %1557  ;;  %v1176_v22 = vadd.f32 1.0, %v1556_v2  ;;  %1567 = vrcp.f32 %v1174_v21 }
 0x167   : > { %v1560_v46 = vpop.eup %1559  ;;  %v1177_v45 = vadd.f32 1.0, %v1558_v47  ;;  %1569 = vrcp.f32 %v1175_v0 }
 0x168   : > { %v1562_v43 = vpop.eup %1561  ;;  %v1178_v23 = vadd.f32 1.0, %v1560_v46  ;;  %1571 = vrcp.f32 %v1176_v22 }
 0x169   : > { %v1179_v48 = vadd.f32 1.0, %v1562_v43  ;;  %1573 = vrcp.f32 %v1177_v45 }
 0x16a   : > { %1575 = vrcp.f32 %v1178_v23 }
 0x16b   : > { %1577 = vrcp.f32 %v1179_v48 }
 0x16e   : > { %v1564_v28 = vpop.eup %1563 }
 0x16f   : > { %v1566_v25 = vpop.eup %1565  ;;  %v1199_v26 = vrot.slane %v1564_v28, %v2856_v29 }
 0x170   : > { %v1568_v30 = vpop.eup %1567  ;;  %v1203_v27 = vrot.slane %v1566_v25, %v2856_v29 }
 0x171   : > { %v1570_v13 = vpop.eup %1569  ;;  %v1207_v9 = vrot.slane %v1568_v30, %v2856_v29 }
 0x172   : > { %v1572_v50 = vpop.eup %1571  ;;  %v1211_v31 = vrot.slane %v1570_v13, %v2856_v29  ;;  %v1236_v61 = vcombine.low %v1199_v26, %v1203_v27 }
 0x173   : > { %v1574_v41 = vpop.eup %1573  ;;  %v1215_v52 = vrot.slane %v1572_v50, %v2856_v29 }
 0x174   : > { %v1576_v57 = vpop.eup %1575  ;;  %v1219_v17 = vrot.slane %v1574_v41, %v2856_v29  ;;  %v1237_v53 = vcombine.low %v1207_v9, %v1211_v31  ;;  %v1244_v51 = vmul.f32 %v1236_v61, %v2857_v59 }
 0x175   : > { %v1578_v58 = vpop.eup %1577  ;;  %v1223_v18 = vrot.slane %v1576_v57, %v2856_v29 }
 0x176   : > { %v1227_v56 = vrot.slane %v1578_v58, %v2856_v29  ;;  %v1238_v1 = vcombine.low %v1215_v52, %v1219_v17  ;;  %v1245_v60 = vmul.f32 %v1237_v53, %v2858_v55  ;;  %1248 = vst [vmem:[%s258_s15] sm:$0xff] %v1244_v51 }
 0x178   : > { %v1239_v54 = vcombine.low %v1223_v18, %v1227_v56  ;;  %v1246_v24 = vmul.f32 %v1238_v1, %v2859_v32  ;;  %1249 = vst [vmem:[%s258_s15 + $0x8] sm:$0xff] %v1245_v60 }
 0x17a   : > { %v1247_v33 = vmul.f32 %v1239_v54, %v2860_v36  ;;  %1250 = vst [vmem:[%s258_s15 + $0x10] sm:$0xff] %v1246_v24 }
 0x17c   : > { %1251 = vst [vmem:[%s258_s15 + $0x18] sm:$0xff] %v1247_v33 }
 0x17d   : > { %1680 = shalt.err (!%p1677_p0)
}
 0x17e   : > { %s1681_s11 = scalar_lea.hbm %s2640_s2, 512  ;;  %s1685_s26 = scalar_lea.hbm %s2697_s3, 2048 }
 0x17f   : > { %p1682_p5 = scmp.ne.s32.totalorder %s2640_s2, %s1681_s11  ;;  %p1686_p3 = scmp.lt.u32.totalorder %s2640_s2, %s2697_s3 }
 0x180   : > { %p1687_p13 = scmp.lt.u32.totalorder %s1685_s26, %s1681_s11  ;;  %p1689_p10 = scmp.lt.u32.totalorder %s1681_s11, %s2640_s2 }
 0x181   : > { %p1683_p7 = pnand %p1682_p5, %p2861_p12 }
 0x182   : > { %p1688_p8 = por %p1687_p13, %p1686_p3 }
 0x183   : > { %p1684_p2 = pneg %p1683_p7 }
 0x184   : > { %p1690_p1 = por %p1689_p10, %p1688_p8 }
 0x186   : > { %p1691_p4 = pnand %p1690_p1, %p1684_p2 }
 0x188   : > { %1694 = shalt.err (!%p1691_p4)
}
 0x189   : > { %1431 = dma.vmem_to_hbm [thread:$0]  (%p2861_p12), %s2642_s22, 512, %s2640_s2, %s1253_s9  }
 0x18a PF: > { %s2862_s8 = sld [smem:[#allocation13_spill]]  ;;  %s2863_s20 = sld [smem:[#allocation15_spill]] }
 0x18b   : > { %p1451_p9 = scmp.ge.s32.totalorder %s1773_s19, 2 }
 0x190   : > { %s1281_s23 = sand.u32 1, %s2862_s8   ;;  %p2864_p11 = scmp.ne.s32.totalorder %s2863_s20, 0 }
 0x191   : > { %s1282_s10 = scalar_lea.sflag [#allocation4], %s1281_s23 }
 0x192   : > { %p1445_p6 = pnand %p1451_p9, %p2864_p11 }
 0x194   : > { %1740 = dma.done.wait (!%p1445_p6), %s1282_s10, 512  }
 0x195   : > { %1742 = vsyncadd (!%p1445_p6), %s1282_s10, 4294966784  ;;  %s22_s19 = sadd.s32 1, %s1773_s19   ;;  %s2865_s15 = sld [smem:[#allocation14_spill]] }
 0x196   : > { %p19_p0 = scmp.ge.s32.totalorder %s22_s19, 6   ;;  %s2866_s17 = sld [smem:[#allocation16_spill]] }
 0x197   : > { %s2867_s12 = smov %s1749_s13  ;;  %s2868_s13 = smov %s1753_s14 }
 0x198   : > { %s2869_s14 = smov %s1954_s30  ;;  %s2870_s16 = smov %s1769_s18 }
 0x199   : > { %s2871_s18 = smov %s2877_s5  ;;  %21 = sbr.rel (!%p19_p0) target bundleno = 11 (0xb), region = 94 }
 0x1a0   :  { %1287 = vsyncpa [#allocation3], 1 }
 0x1a1   :  { %1289 = vsyncpa [#allocation3 + $0x1], 1 }
 0x1a2   :  { %1290 = vsyncpa [#allocation6], 1 }
 0x1a3   :  { %1292 = vsyncpa [#allocation6 + $0x1], 1 }
 0x1a4   :  { %1293 = vsyncpa [#allocation4], 1 }
 0x1a5   :  { %1295 = vsyncpa [#allocation4 + $0x1], 1 }

</bundles_post_ra>
